<compile_context>
chip_gen: v7x
topology: tpu7x:2x2x1
jax: 0.10.0
libtpu: 0.0.40
codegen_flags: <defaults>
</compile_context>

<pallas_src>
import jax
import jax.numpy as jnp
from jax.experimental import pallas as pl
from jax.experimental.pallas import tpu as pltpu


def _attention_kernel(x_ref, w_ref, b_ref, out_ref, attw_ref):
    # x_ref:    (TB, S, D)   features block (full feature dim: needed for matmul), f32
    # w_ref:    (D, TD)      pre-transposed nn.Linear weight (in, out), bf16
    # b_ref:    (1, TD)      bias slice, f32
    # out_ref:  (TB, S, TD)  attended features, bf16
    # attw_ref: (TB, S, TD)  attention weights, bf16
    TB, S, D = x_ref.shape
    TD = w_ref.shape[1]

    x = x_ref[...]                                    # (TB, S, D) f32
    xm = x.reshape(TB * S, D).astype(jnp.bfloat16)    # one MXU-shaped matmul

    # scores = x @ W^T + b; W was transposed in the wrapper so this is a plain
    # (M,K)@(K,N) contraction (no per-step weight transpose), f32 accumulation.
    scores = jnp.dot(xm, w_ref[...],
                     preferred_element_type=jnp.float32) + b_ref[...]
    scores = jnp.tanh(scores).reshape(TB, S, TD)      # (TB, S, TD) f32

    # Softmax over the sequence axis. tanh bounds scores to [-1, 1], so exp
    # cannot overflow and the usual max-subtraction is unnecessary.
    e = jnp.exp(scores)                               # (TB, S, TD)
    denom = jnp.sum(e, axis=1, keepdims=True)         # (TB, 1, TD)
    r = pl.reciprocal(denom, approx=True)             # EUP vrcp
    r = r * (2.0 - denom * r)                         # one Newton step -> f32 accurate
    attw = e * r                                      # (TB, S, TD)

    # Gate the matching feature columns of the (already loaded) input.
    if TD == D:                                       # static (trace-time) branch
        x_cols = x
    else:
        j = pl.program_id(1)
        col0 = pl.multiple_of(j * TD, TD)
        x_cols = jax.lax.dynamic_slice_in_dim(x, col0, TD, axis=2)

    attw_ref[...] = attw.astype(attw_ref.dtype)
    out_ref[...] = (x_cols * attw).astype(out_ref.dtype)


def _vmem_capacity_bytes():
    try:
        return int(pltpu.get_tpu_info().vmem_capacity_bytes)
    except Exception:
        return 64 * 2 ** 20        # conservative fallback (v7x-sized)


def _footprint(tb, S, D, TD):
    x_b = 2 * tb * S * D * 4                 # f32 features, double-buffered
    w_b = 2 * D * TD * 2                     # bf16 weight, double-buffered
    b_b = 2 * TD * 4                         # bias
    o_b = 2 * 2 * tb * S * TD * 2            # two bf16 outputs, double-buffered
    tmp = 4 * tb * S * max(D, TD) * 4        # rough in-kernel intermediates
    return x_b + w_b + b_b + o_b + tmp


def _pick_tiles(B, S, D):
    vmem_cap = _vmem_capacity_bytes()
    if vmem_cap >= 96 * 2 ** 20:             # v5e / v6e: 128 MiB VMEM
        budget = 72 * 2 ** 20
        limit_cap = 96 * 2 ** 20
    else:                                    # v7x: 64 MiB per TensorCore
        budget = 24 * 2 ** 20
        limit_cap = 38 * 2 ** 20

    # Output-feature tile: keep the full weight resident (DMA'd exactly once)
    # whenever the double-buffered bf16 weight comfortably fits; otherwise a
    # lane-dense multiple of 128.
    if 2 * D * D * 2 <= budget // 3:
        TD = D
    elif D % 512 == 0:
        TD = 512
    elif D % 256 == 0:
        TD = 256
    elif D % 128 == 0:
        TD = 128
    else:
        TD = D

    # Batch tile: grow while the footprint fits (soft stop at TB*S ~ 2048).
    # No divisibility requirement; the grid uses pl.cdiv and Pallas masks the
    # boundary block (safe: softmax reduces over S, never over the padded axis,
    # and tanh keeps padded garbage finite).
    tb_best = 1
    for tb in range(1, B + 1):
        if _footprint(tb, S, D, TD) > budget:
            break
        tb_best = tb
        if tb * S >= 2048:
            break

    # Keep at least one "parallel" grid axis >= 2 so both v7x TensorCores get
    # work (costs at most one extra weight fetch on v5e/v6e).
    if D // TD < 2 and B >= 2:
        tb_best = min(tb_best, -(-B // 2))

    # TODO(synk): on v6e, additionally round TB so TB*S is a multiple of 256
    # for full MXU occupancy on the last pass; not enforced for tiny shapes.
    est = _footprint(tb_best, S, D, TD)
    vmem_limit = int(min(max(2 * est, 16 * 2 ** 20), limit_cap))
    return tb_best, TD, vmem_limit


@jax.jit
def attention_mechanism(features, weight, bias):
    """features: (B, S, D) f32; weight: (D, D) nn.Linear layout (out, in); bias: (D,).

    Returns (attended_features, attention_weights), both bf16 (perf: the kernel
    is HBM-bound; bf16 outputs cut total HBM traffic ~33%).
    """
    B, S, D = features.shape
    TB, TD, vmem_limit = _pick_tiles(B, S, D)

    # One-time transpose + bf16 cast of the weight outside the kernel:
    # (out, in) -> (in, out) so the in-kernel contraction needs no XLU transpose.
    w_t = weight.T.astype(jnp.bfloat16)                 # (D_in, D_out)
    b2 = bias.reshape(1, D).astype(jnp.float32)

    grid = (pl.cdiv(B, TB), D // TD)

    out_shapes = (
        jax.ShapeDtypeStruct((B, S, D), jnp.bfloat16),  # attended_features
        jax.ShapeDtypeStruct((B, S, D), jnp.bfloat16),  # attention_weights
    )

    grid_spec = pltpu.PrefetchScalarGridSpec(
        num_scalar_prefetch=0,
        grid=grid,
        in_specs=[
            pl.BlockSpec((TB, S, D), lambda i, j: (i, 0, 0)),   # features
            pl.BlockSpec((D, TD), lambda i, j: (0, j)),          # weight (in, out)
            pl.BlockSpec((1, TD), lambda i, j: (0, j)),          # bias slice
        ],
        out_specs=[
            pl.BlockSpec((TB, S, TD), lambda i, j: (i, 0, j)),
            pl.BlockSpec((TB, S, TD), lambda i, j: (i, 0, j)),
        ],
    )

    return pl.pallas_call(
        _attention_kernel,
        out_shape=out_shapes,
        grid_spec=grid_spec,
        compiler_params=pltpu.CompilerParams(
            dimension_semantics=("parallel", "parallel"),
            vmem_limit_bytes=vmem_limit,
        ),
    )(features, w_t, b2)


def _reference(features, weight, bias, matmul_dtype=jnp.float32):
    x = features.astype(matmul_dtype)
    w = weight.astype(matmul_dtype)
    scores = jax.lax.dot_general(
        x, w, dimension_numbers=(((2,), (1,)), ((), ())),
        preferred_element_type=jnp.float32) + bias
    scores = jnp.tanh(scores)
    attw = jax.nn.softmax(scores, axis=1)
    return features * attw, attw


if __name__ == "__main__":
    B, S, D = 2, 8, 32
    key = jax.random.PRNGKey(0)
    kx, kw, kb = jax.random.split(key, 3)

    features = jax.random.normal(kx, (B, S, D), dtype=jnp.float32)
    # deterministic Linear params (shapes from nn.Linear(feature_dim, feature_dim))
    limit = 1.0 / (D ** 0.5)
    weight = jax.random.uniform(kw, (D, D), minval=-limit, maxval=limit,
                                dtype=jnp.float32)
    bias = jax.random.uniform(kb, (D,), minval=-limit, maxval=limit,
                              dtype=jnp.float32)

    attended, attw = attention_mechanism(features, weight, bias)
    jax.block_until_ready((attended, attw))

    attended_f32 = attended.astype(jnp.float32)
    attw_f32 = attw.astype(jnp.float32)

    # Apples-to-apples: reference using the same bf16 MXU operands
    # (remaining difference is the bf16 rounding of the stored outputs).
    ref_out_bf16, ref_w_bf16 = _reference(features, weight, bias,
                                          matmul_dtype=jnp.bfloat16)
    assert jnp.allclose(attended_f32, ref_out_bf16, atol=2e-2, rtol=2e-2)
    assert jnp.allclose(attw_f32, ref_w_bf16, atol=2e-2, rtol=2e-2)

    # Sanity vs full-f32 math (bf16 matmul + bf16 output rounding differ).
    ref_out_f32, ref_w_f32 = _reference(features, weight, bias)
    assert jnp.allclose(attended_f32, ref_out_f32, atol=5e-2, rtol=5e-2)
    assert jnp.allclose(attw_f32, ref_w_f32, atol=5e-2, rtol=5e-2)

    # Attention weights must sum to ~1 over the sequence axis (bf16 rounding).
    assert jnp.allclose(jnp.sum(attw_f32, axis=1), 1.0, atol=2e-2)

    print("KERNEL_OK")
</pallas_src>

<mosaic_0001>
module attributes {stable_mosaic.version = 11 : i64} {
  func.func @_attention_kernel(%arg0: i32, %arg1: i32, %arg2: memref<1x8x32xf32, #tpu.memory_space<vmem>>, %arg3: memref<32x32xbf16, #tpu.memory_space<vmem>>, %arg4: memref<1x32xf32, #tpu.memory_space<vmem>>, %arg5: memref<1x8x32xbf16, #tpu.memory_space<vmem>>, %arg6: memref<1x8x32xbf16, #tpu.memory_space<vmem>>) attributes {dimension_semantics = [#tpu.dimension_semantics<parallel>, #tpu.dimension_semantics<parallel>], iteration_bounds = array<i64: 2, 1>, scalar_prefetch = 0 : i64, scratch_operands = 0 : i64, tpu.core_type = #tpu.core_type<tc>, window_params = [{transform_indices = @transform_0, window_bounds = array<i64: 1, 8, 32>}, {transform_indices = @transform_1, window_bounds = array<i64: 32, 32>}, {transform_indices = @transform_2, window_bounds = array<i64: 1, 32>}, {transform_indices = @transform_3, window_bounds = array<i64: 1, 8, 32>}, {transform_indices = @transform_4, window_bounds = array<i64: 1, 8, 32>}]} {
    %c0 = arith.constant 0 : index
    %c0_0 = arith.constant 0 : index
    %c0_1 = arith.constant 0 : index
    %0 = vector.load %arg2[%c0, %c0_0, %c0_1] : memref<1x8x32xf32, #tpu.memory_space<vmem>>, vector<1x8x32xf32>
    %1 = vector.shape_cast %0 : vector<1x8x32xf32> to vector<8x32xf32>
    %2 = arith.truncf %1 : vector<8x32xf32> to vector<8x32xbf16>
    %c0_2 = arith.constant 0 : index
    %c0_3 = arith.constant 0 : index
    %3 = vector.load %arg3[%c0_2, %c0_3] : memref<32x32xbf16, #tpu.memory_space<vmem>>, vector<32x32xbf16>
    %cst = arith.constant dense<0.000000e+00> : vector<8x32xf32>
    %4 = tpu.matmul %2, %3, %cst {dimension_numbers = #tpu.dot_dimension_numbers<[1], [0], [0], [1], [0, 0, 1, 1], [], []>} : vector<8x32xbf16>, vector<32x32xbf16>, vector<8x32xf32> -> vector<8x32xf32>
    %c0_4 = arith.constant 0 : index
    %c0_5 = arith.constant 0 : index
    %5 = vector.load %arg4[%c0_4, %c0_5] : memref<1x32xf32, #tpu.memory_space<vmem>>, vector<1x32xf32>
    %6 = vector.broadcast %5 : vector<1x32xf32> to vector<8x32xf32>
    %7 = arith.addf %4, %6 : vector<8x32xf32>
    %8 = math.tanh %7 : vector<8x32xf32>
    %9 = vector.shape_cast %8 : vector<8x32xf32> to vector<1x8x32xf32>
    %10 = math.exp %9 : vector<1x8x32xf32>
    %cst_6 = arith.constant dense<0.000000e+00> : vector<1x32xf32>
    %11 = vector.multi_reduction <add>, %10, %cst_6 [1] : vector<1x8x32xf32> to vector<1x32xf32>
    %12 = vector.shape_cast %11 : vector<1x32xf32> to vector<1x1x32xf32>
    %13 = tpu.reciprocal %12 {approx = true} : vector<1x1x32xf32> -> vector<1x1x32xf32>
    %14 = arith.mulf %12, %13 : vector<1x1x32xf32>
    %cst_7 = arith.constant 2.000000e+00 : f32
    %15 = vector.broadcast %cst_7 : f32 to vector<1x1x32xf32>
    %16 = arith.subf %15, %14 : vector<1x1x32xf32>
    %17 = arith.mulf %13, %16 : vector<1x1x32xf32>
    %18 = vector.broadcast %17 : vector<1x1x32xf32> to vector<1x8x32xf32>
    %19 = arith.mulf %10, %18 : vector<1x8x32xf32>
    %20 = arith.truncf %19 : vector<1x8x32xf32> to vector<1x8x32xbf16>
    %c0_8 = arith.constant 0 : index
    %c0_9 = arith.constant 0 : index
    %c0_10 = arith.constant 0 : index
    %21 = vector.load %arg6[%c0_8, %c0_9, %c0_10] : memref<1x8x32xbf16, #tpu.memory_space<vmem>>, vector<1x8x32xbf16>
    tpu.vector_store %arg6[%c0_8, %c0_9, %c0_10], %20 {strides = array<i32>} : memref<1x8x32xbf16, #tpu.memory_space<vmem>>, vector<1x8x32xbf16>,
    %22 = arith.mulf %0, %19 : vector<1x8x32xf32>
    %23 = arith.truncf %22 : vector<1x8x32xf32> to vector<1x8x32xbf16>
    %c0_11 = arith.constant 0 : index
    %c0_12 = arith.constant 0 : index
    %c0_13 = arith.constant 0 : index
    %24 = vector.load %arg5[%c0_11, %c0_12, %c0_13] : memref<1x8x32xbf16, #tpu.memory_space<vmem>>, vector<1x8x32xbf16>
    tpu.vector_store %arg5[%c0_11, %c0_12, %c0_13], %23 {strides = array<i32>} : memref<1x8x32xbf16, #tpu.memory_space<vmem>>, vector<1x8x32xbf16>,
    return
  }
  func.func @transform_0(%arg0: i32, %arg1: i32) -> (i32, i32, i32) {
    %c0_i32 = arith.constant 0 : i32
    %c0_i32_0 = arith.constant 0 : i32
    %c0_i32_1 = arith.constant 0 : i32
    return %arg0, %c0_i32, %c0_i32_0 : i32, i32, i32
  }
  func.func @transform_1(%arg0: i32, %arg1: i32) -> (i32, i32) {
    %c0_i32 = arith.constant 0 : i32
    %c0_i32_0 = arith.constant 0 : i32
    return %c0_i32, %arg1 : i32, i32
  }
  func.func @transform_2(%arg0: i32, %arg1: i32) -> (i32, i32) {
    %c0_i32 = arith.constant 0 : i32
    %c0_i32_0 = arith.constant 0 : i32
    return %c0_i32, %arg1 : i32, i32
  }
  func.func @transform_3(%arg0: i32, %arg1: i32) -> (i32, i32, i32) {
    %c0_i32 = arith.constant 0 : i32
    %c0_i32_0 = arith.constant 0 : i32
    return %arg0, %c0_i32, %arg1 : i32, i32, i32
  }
  func.func @transform_4(%arg0: i32, %arg1: i32) -> (i32, i32, i32) {
    %c0_i32 = arith.constant 0 : i32
    %c0_i32_0 = arith.constant 0 : i32
    return %arg0, %c0_i32, %arg1 : i32, i32, i32
  }
}

</mosaic_0001>

<bundles_post_ra>
// kernel: attention_mechanism.1
= control target key start
LH: loop header
LB: loop body
LE: loop exit
PB: predicated region body
PF: predicated region fallthrough
CT: control target
= control target key end

     0   :  { %10 = vsyncpa [#allocation3], 0  ;;  %s906_s0 = inlined_call_operand.vmem [shape: f32[2,8,32], index: 0, kind: input, shape index: {}]   ;;  %s907_s1 = inlined_call_operand.vmem [shape: bf16[32,32], index: 1, kind: input, shape index: {}]   ;;  %s908_s2 = inlined_call_operand.vmem [shape: f32[1,32], index: 2, kind: input, shape index: {}]   ;;  %s909_s3 = inlined_call_operand.hbm [shape: bf16[2,8,32], index: 3, kind: output, shape index: {0}]   ;;  %s910_s4 = inlined_call_operand.hbm [shape: bf16[2,8,32], index: 4, kind: output, shape index: {1}]  }
   0x1   :  { %12 = vsyncpa [#allocation3 + $0x1], 0 }
   0x2   :  { %13 = vsyncpa [#allocation5], 0 }
   0x3   :  { %15 = vsyncpa [#allocation5 + $0x1], 0  ;;  %s746_s15 = smov 0   ;;  %s748_s16 = smov 0  }
   0x4   :  { %s750_s17 = smov 0   ;;  %s752_s18 = smov 0  }
   0x5   :  { %s754_s19 = smov 0   ;;  %s756_s20 = smov 0  }
   0x6 LB: > { %s504_s21 = sadd.s32 4294967295, %s715_s20   ;;  %s505_s22 = sadd.s32 4294967294, %s715_s20   ;;  %s715_s20 = sphi %s756_s20, %s21_s20   ;;  %s711_s19 = sphi %s754_s19, %s917_s19   ;;  %s707_s18 = sphi %s752_s18, %s916_s18   ;;  %s703_s17 = sphi %s750_s17, %s915_s17   ;;  %s699_s16 = sphi %s748_s16, %s914_s16   ;;  %s695_s15 = sphi %s746_s15, %s913_s15  }
   0x7   : > { %s33_s23 = sadd.s32 1, %s711_s19  ;;  %s120_s24 = sadd.s32 1, %s703_s17 }
   0x8   : > { %p35_p0 = scmp.ge.s32.totalorder %s33_s23, 2  ;;  %p130_p1 = scmp.ne.s32.totalorder %s703_s17, %s699_s16 }
   0x9   : > { %p131_p2 = scmp.eq.s32.totalorder %s504_s21, 1  ;;  %p136_p3 = scmp.ne.s32.totalorder %s699_s16, %s695_s15 }
   0xa   : > { %s919_s23 = smov (%p35_p0, %s33_s23), 0  ;;  %p137_p5 = scmp.eq.s32.totalorder %s505_s22, 1 }
   0xb   : > { %p786_p4 = por %p131_p2, %p130_p1  ;;  %s115_s26 = ssub.s32 %s711_s19, %s919_s23 }
   0xc   : > { %p510_p6 = scmp.ge.s32.totalorder %s715_s20, 1  ;;  %p118_p7 = scmp.eq.s32.totalorder %s115_s26, 0 }
   0xd   : > { %p793_p8 = por %p137_p5, %p136_p3  ;;  %p203_p9 = scmp.lt.s32.totalorder %s715_s20, 3 }
   0xe   : > { %s799_s28 = scalar_select %p118_p7, %s703_s17, %s120_s24  }
   0xf   : > { %p204_p10 = pnand %p510_p6, %p203_p9 }
  0x10   : > { %v597_v0 = vld [vmem:[%s907_s1] sm:$0xff] (!%p204_p10)   ;;  %v717_v1 = vmov (!%p204_p10), 0.0   ;;  %v598_v2 = vld [vmem:[%s907_s1 + $0x8] sm:$0xff] (!%p204_p10)   ;;  %vm718_vm0 = vmmov (!%p204_p10), 0   ;;  %p240_p11 = scmp.lt.s32.totalorder (!%p204_p10), %s707_s18, 1  ;;  %vm277_vm1 = vcmask (!%p204_p10), 261120  }
  0x11   : > { %207 = sbr.rel (%p204_p10) target bundleno = 340 (0x154), region = 32  ;;  %527 = vmatprep.subr.bf16.mxu0 (!%p204_p10), %v717_v1  ;;  %531 = vmatprep.mubr.msk.bf16.mxu0 (!%p204_p10), %vm718_vm0, %v717_v1  ;;  %v514_v5 = vld [vmem:[%s908_s2] ss:$0 sm:$0xff] (!%p204_p10)  ;;  %s816_s14 = sand.u32 (!%p204_p10), 1, %s699_s16   ;;  %vm337_vm2 = vcmask (!%p204_p10), 257024  }
  0x12   : > { %528 = vmatpush3.bf16.msra.mxu0 (!%p204_p10), %v597_v0  ;;  %s511_s21 = sshll.u32 (!%p204_p10), %s816_s14, 2  ;;  %s520_s22 = sshll.u32 (!%p204_p10), %s707_s18, 6 }
  0x13   : > { %529 = vmatprep.subr.bf16.mxu0 (!%p204_p10), %v717_v1  ;;  %s239_s24 = scalar_lea.vmem (!%p204_p10), [#allocation4], %s511_s21  ;;  %s820_s29 = scalar_lea.vmem (!%p204_p10), [#allocation2], %s511_s21 }
  0x14   : > { %s376_s26 = sshll.u32 (!%p204_p10), %s239_s24, 4  ;;  %s362_s30 = sshll.u32 (!%p204_p10), %s820_s29, 4  ;;  %s828_s26 = int_to_ptr.vmem [resolvable:$true] %s376_s26  ;;  %s835_s30 = int_to_ptr.vmem [resolvable:$true] %s362_s30 }
  0x15   : > { %s833_s9 = scalar_lea.hbm (!%p204_p10), %s909_s3, %s520_s22  ;;  %s348_s10 = scalar_lea.sflag (!%p204_p10), [#allocation5], %s816_s14 }
  0x16   : > { %530 = vmatpush3.bf16.msra.mxu0 (!%p204_p10), %v598_v2  ;;  %s719_s12 = smov (!%p204_p10), [#allocation4]  }
  0x17   : > { %s609_s13 = sshll.u32 (!%p204_p10), %s719_s12, 4  ;;  %s610_s13 = int_to_ptr.vmem [resolvable:$false] %s609_s13 }
  0x18   : > { %s241_s7 = scalar_select %p240_p11, %s707_s18, 1 }
  0x19   : > { %s611_s21 = scalar_lea.vmem %s610_s13, 128  ;;  %p612_p1 = scmp.lt.s32.totalorder %s828_s26, %s610_s13 }
  0x1a   : > { %s513_s8 = sshll.u32 %s241_s7, 3  ;;  %s826_s7 = scalar_lea.hbm %s910_s4, %s520_s22 }
  0x1b   : > { %s243_s11 = scalar_lea.vmem %s906_s0, %s513_s8 }
  0x1c   : > { %v252_v3 = vld [vmem:[%s243_s11] sm:$0xff]  ;;  %s605_s11 = scalar_lea.vmem %s828_s26, 64 }
  0x1d   : > { %v253_v4 = vpack.c.bf16 %v252_v3, %v252_v3  ;;  %p606_p12 = scmp.ne.s32.totalorder %s828_s26, %s605_s11  ;;  %p613_p2 = scmp.lt.s32.totalorder %s611_s21, %s605_s11 }
  0x1f   : > { %532 = vmatmul.mubr.msk.bf16.vlgmr.msra.gmra.mrb[0].mxu0 %vm277_vm1, %v253_v4  ;;  %p607_p13 = pnand %p606_p12, %p786_p4  ;;  %p614_p3 = por %p613_p2, %p612_p1 }
  0x21   : > { %p608_p0 = pneg %p607_p13 }
  0x23   : > { %p615_p5 = pnand %p614_p3, %p608_p0 }
  0xf2   : > { %v315_v6 = vpop.f32.mrb[0].mxu0 }
  0xf3   : > { %v316_v7 = vadd.f32 %v514_v5, %v315_v6  ;;  %v533_v8 = vpop.f32.mrb[1].mxu0 }
  0xf4   : > { %v318_v9 = vpop.f32.mrb[2].mxu0 }
  0xf5   : > { %599 = vtanh.f32 %v316_v7  ;;  %v534_v10 = vpop.f32.mrb[3].mxu0 }
  0xff   : > { %v600_v11 = vpop.eup %599 }
 0x100   : > { %v322_v12 = vmul.f32 1.442695, %v600_v11 }
 0x102   : > { %601 = vpow2.f32 %v322_v12 }
 0x10c   : > { %v602_v13 = vpop.eup %601 }
 0x10d   : > { %v324_v14 = vsel %vm277_vm1, %v602_v13, 0.0 }
 0x10e   : > { %v325_v15 = vrot.slane %v324_v14, 4 }
 0x110   : > { %v326_v16 = vadd.f32 %v325_v15, %v324_v14 }
 0x112   : > { %v327_v17 = vrot.slane %v326_v16, 2 }
 0x114   : > { %v328_v18 = vadd.f32 %v327_v17, %v326_v16 }
 0x116   : > { %v329_v19 = vrot.slane %v328_v18, 1 }
 0x118   : > { %v330_v20 = vadd.f32 %v329_v19, %v328_v18 }
 0x11a   : > { %603 = vrcp.f32 %v330_v20 }
 0x124   : > { %v604_v21 = vpop.eup %603 }
 0x125   : > { %v332_v22 = vmul.f32 %v604_v21, %v330_v20 }
 0x127   : > { %v333_v23 = vsub.f32 2.0, %v332_v22 }
 0x129   : > { %v334_v24 = vmul.f32 %v604_v21, %v333_v23 }
 0x12b   : > { %v335_v25 = vmul.f32 %v602_v13, %v334_v24 }
 0x12d   : > { %v339_v26 = vmul.f32 %v335_v25, %v252_v3  ;;  %v336_v27 = vpack.c.bf16 %v335_v25, %v335_v25 }
 0x12f   : > { %v340_v28 = vpack.c.bf16 %v339_v26, %v339_v26  ;;  %338 = vst.msk [vmem:[%s239_s24] sm:$0xf] %vm337_vm2, %v336_v27 }
 0x130   : > { %618 = shalt.err (!%p615_p5)
}
 0x131   : > { %s619_s22 = scalar_lea.hbm %s826_s7, 64  ;;  %s623_s6 = scalar_lea.hbm %s910_s4, 128 }
 0x132   : > { %p620_p6 = scmp.ne.s32.totalorder %s826_s7, %s619_s22  ;;  %p624_p10 = scmp.lt.u32.totalorder %s826_s7, %s910_s4 }
 0x133   : > { %p625_p11 = scmp.lt.u32.totalorder %s623_s6, %s619_s22  ;;  %p627_p13 = scmp.lt.u32.totalorder %s619_s22, %s826_s7 }
 0x134   : > { %p621_p7 = pnand %p620_p6, %p786_p4 }
 0x135   : > { %p626_p12 = por %p625_p11, %p624_p10 }
 0x136   : > { %p622_p9 = pneg %p621_p7 }
 0x137   : > { %p628_p0 = por %p627_p13, %p626_p12 }
 0x139   : > { %p629_p1 = pnand %p628_p0, %p622_p9 }
 0x13b   : > { %632 = shalt.err (!%p629_p1)
}
 0x13c   : > { %536 = dma.vmem_to_hbm [thread:$0]  (%p786_p4), %s828_s26, 64, %s826_s7, %s348_s10   ;;  %341 = vst.msk [vmem:[%s820_s29] sm:$0xf] %vm337_vm2, %v340_v28 }
 0x13d   : > { %s343_s11 = scalar_lea.sflag [#allocation3], %s816_s14  ;;  %s633_s12 = scalar_lea.vmem %s835_s30, 64 }
 0x13e   : > { %p634_p2 = scmp.ne.s32.totalorder %s835_s30, %s633_s12  ;;  %s720_s13 = smov [#allocation2]  }
 0x13f   : > { %s637_s21 = sshll.u32 %s720_s13, 4  ;;  %s638_s21 = int_to_ptr.vmem [resolvable:$false] %s637_s21 }
 0x140   : > { %p635_p3 = pnand %p634_p2, %p786_p4  ;;  %s639_s22 = scalar_lea.vmem %s638_s21, 128 }
 0x141   : > { %p640_p6 = scmp.lt.s32.totalorder %s835_s30, %s638_s21  ;;  %p641_p7 = scmp.lt.s32.totalorder %s639_s22, %s633_s12 }
 0x142   : > { %p636_p5 = pneg %p635_p3 }
 0x143   : > { %p642_p9 = por %p641_p7, %p640_p6 }
 0x145   : > { %p643_p10 = pnand %p642_p9, %p636_p5 }
 0x147   : > { %646 = shalt.err (!%p643_p10)
}
 0x148   : > { %s647_s14 = scalar_lea.hbm %s833_s9, 64  ;;  %s651_s7 = scalar_lea.hbm %s909_s3, 128 }
 0x149   : > { %p648_p11 = scmp.ne.s32.totalorder %s833_s9, %s647_s14  ;;  %p652_p0 = scmp.lt.u32.totalorder %s833_s9, %s909_s3 }
 0x14a   : > { %p653_p1 = scmp.lt.u32.totalorder %s651_s7, %s647_s14  ;;  %p655_p3 = scmp.lt.u32.totalorder %s647_s14, %s833_s9 }
 0x14b   : > { %p649_p12 = pnand %p648_p11, %p786_p4 }
 0x14c   : > { %p654_p2 = por %p653_p1, %p652_p0 }
 0x14d   : > { %p650_p13 = pneg %p649_p12 }
 0x14e   : > { %p656_p5 = por %p655_p3, %p654_p2 }
 0x150   : > { %p657_p6 = pnand %p656_p5, %p650_p13 }
 0x152   : > { %660 = shalt.err (!%p657_p6)
}
 0x153   : > { %535 = dma.vmem_to_hbm [thread:$0]  (%p786_p4), %s835_s30, 64, %s833_s9, %s343_s11  }
 0x154 PF: > { %p546_p7 = scmp.ge.s32.totalorder %s715_s20, 2  ;;  %s388_s5 = sand.u32 1, %s695_s15  }
 0x155   : > { %s389_s6 = scalar_lea.sflag [#allocation3], %s388_s5 }
 0x156   : > { %p540_p9 = pnand %p546_p7, %p793_p8 }
 0x158   : > { %686 = dma.done.wait (!%p540_p9), %s389_s6, 64  }
 0x159   : > { %688 = vsyncadd (!%p540_p9), %s389_s6, 4294967232  ;;  %s398_s18 = scalar_lea.sflag [#allocation5], %s388_s5 }
 0x15a   : > { %690 = dma.done.wait (!%p540_p9), %s398_s18, 64  }
 0x15b   : > { %692 = vsyncadd (!%p540_p9), %s398_s18, 4294967232  ;;  %s21_s20 = sadd.s32 1, %s715_s20   ;;  %s913_s15 = smov %s699_s16 }
 0x15c   : > { %p18_p10 = scmp.ge.s32.totalorder %s21_s20, 4   ;;  %s914_s16 = smov %s703_s17 }
 0x15d   : > { %s915_s17 = smov %s799_s28  ;;  %s916_s18 = smov %s711_s19 }
 0x15e   : > { %s917_s19 = smov %s919_s23  ;;  %20 = sbr.rel (!%p18_p10) target bundleno = 6 (0x6), region = 90 }
 0x165   :  { %403 = vsyncpa [#allocation3], 1 }
 0x166   :  { %405 = vsyncpa [#allocation3 + $0x1], 1 }
 0x167   :  { %406 = vsyncpa [#allocation5], 1 }
 0x168   :  { %408 = vsyncpa [#allocation5 + $0x1], 1 }

</bundles_post_ra>
